<compile_context>
chip_gen: v5e
topology: v5e:2x2
jax: 0.10.0
libtpu: 0.0.40
codegen_flags: <defaults>
</compile_context>

<pallas_src>
import jax
import jax.numpy as jnp
from jax.experimental import pallas as pl
from jax.experimental.pallas import tpu as pltpu


def _round_up(x, m):
    return ((x + m - 1) // m) * m


def _soft_dice_kernel(x_ref, t_ref, m_ref,
                      t_sum_o, inter_raw_o, in_sum_raw_o,
                      inter_sig_o, in_sum_sig_o, oor_o,
                      t_sum_a, inter_raw_a, in_sum_raw_a,
                      inter_sig_a, in_sum_sig_a, oor_a):
    f = pl.program_id(1)

    accs = (t_sum_a, inter_raw_a, in_sum_raw_a, inter_sig_a, in_sum_sig_a, oor_a)
    outs = (t_sum_o, inter_raw_o, in_sum_raw_o, inter_sig_o, in_sum_sig_o, oor_o)

    @pl.when(f == 0)
    def _init():
        for a in accs:
            a[...] = jnp.zeros_like(a)

    x = x_ref[...].astype(jnp.float32)   # (bn, bf)
    t = t_ref[...].astype(jnp.float32)   # (bn, bf)
    m = m_ref[...].astype(jnp.float32)   # (bn, bf)

    # Sigmoid on the EUP; cost is hidden behind the HBM streaming.
    xs = 1.0 / (1.0 + jnp.exp(-x))

    xm = x * m       # masked raw input
    xsm = xs * m     # masked sigmoid(input)
    tm = t * m       # masked target

    def rowsum(v):   # (bn, bf) -> (bn, 1): VPU adds + one cross-lane reduce/tile
        return jnp.sum(v, axis=1, keepdims=True)

    t_sum_a[...]      += rowsum(tm)
    inter_raw_a[...]  += rowsum(xm * tm)
    in_sum_raw_a[...] += rowsum(xm)
    inter_sig_a[...]  += rowsum(xsm * tm)
    in_sum_sig_a[...] += rowsum(xsm)
    # Out-of-range element count of the *unmasked* input (drives the torch
    # `if not all(0 <= x <= 1)` branch); only `> 0` matters downstream.
    oor_a[...]        += rowsum(jnp.where((x < 0.0) | (x > 1.0), 1.0, 0.0))

    @pl.when(f == pl.num_programs(1) - 1)
    def _write():
        for o, a in zip(outs, accs):
            o[...] = a[...]


def soft_dice_loss(inp, target, loss_mask=None, smooth=1e-5,
                   *, max_block_rows=128, max_block_cols=8192):
    """SoftDiceLoss(smooth)(input, target, loss_mask) with a fused TPU kernel."""
    N = inp.shape[0]
    x2 = inp.reshape(N, -1)
    t2 = target.reshape(N, -1)
    F_ = x2.shape[1]

    if loss_mask is not None:
        m2 = loss_mask.reshape(N, -1)
        if m2.shape[1] != F_:
            raise ValueError("loss_mask must flatten to the same per-batch size as input")
    else:
        # TODO(synk): a mask-free kernel variant would save one HBM stream.
        m2 = jnp.ones((N, F_), dtype=x2.dtype)

    # ---- pick lane/sublane-dense block sizes (big tiles, full vregs) ----
    LANE, SUB = 128, 8
    max_block_cols = max(LANE, (max_block_cols // LANE) * LANE)
    max_block_rows = max(SUB, (max_block_rows // SUB) * SUB)

    bf = min(_round_up(F_, LANE), max_block_cols)
    F_pad = _round_up(F_, bf)
    if N <= SUB:
        bn, N_pad = N, N                       # full-dim row block (rule-exempt)
    else:
        bn = min(_round_up(N, SUB), max_block_rows)
        N_pad = _round_up(N, bn)

    pad_n, pad_f = N_pad - N, F_pad - F_
    if pad_n or pad_f:
        # Zero padding is neutral: pad values lie in [0,1] (never trip the
        # sigmoid branch) and the padded mask is 0, so no sum is affected.
        x2 = jnp.pad(x2, ((0, pad_n), (0, pad_f)))
        t2 = jnp.pad(t2, ((0, pad_n), (0, pad_f)))
        m2 = jnp.pad(m2, ((0, pad_n), (0, pad_f)))

    grid = (N_pad // bn, F_pad // bf)

    tile_bytes = bn * bf * (x2.dtype.itemsize + t2.dtype.itemsize + m2.dtype.itemsize)
    # ~3x one tile-set covers double buffering + scratch; clamp to a range that
    # is safe on v5e/v6e (128 MiB) and v7x (64 MiB physical VMEM).
    vmem_limit = int(min(64 * 1024 * 1024, max(32 * 1024 * 1024, 3 * tile_bytes)))

    data_spec = pl.BlockSpec((bn, bf), lambda i, f: (i, f))
    stat_spec = pl.BlockSpec((bn, 1), lambda i, f: (i, 0))
    stat_shape = jax.ShapeDtypeStruct((N_pad, 1), jnp.float32)

    outs = pl.pallas_call(
        _soft_dice_kernel,
        out_shape=tuple(stat_shape for _ in range(6)),
        grid_spec=pltpu.PrefetchScalarGridSpec(
            num_scalar_prefetch=0,
            grid=grid,
            in_specs=[data_spec, data_spec, data_spec],
            out_specs=[stat_spec] * 6,
            scratch_shapes=[pltpu.VMEM((bn, 1), jnp.float32) for _ in range(6)],
        ),
        compiler_params=pltpu.CompilerParams(
            dimension_semantics=("parallel", "arbitrary"),
            vmem_limit_bytes=vmem_limit,
        ),
    )(x2, t2, m2)

    t_sum, inter_raw, in_sum_raw, inter_sig, in_sum_sig, oor = (o[:N, 0] for o in outs)

    # torch: apply sigmoid iff ANY element of the raw input is outside [0, 1].
    apply_sigmoid = jnp.sum(oor) > 0.0
    intersection = jnp.where(apply_sigmoid, inter_sig, inter_raw)
    input_sum = jnp.where(apply_sigmoid, in_sum_sig, in_sum_raw)

    dice = (2.0 * intersection + smooth) / (input_sum + t_sum + smooth)
    return 1.0 - jnp.mean(dice)


def _soft_dice_ref(inp, target, loss_mask=None, smooth=1e-5):
    """Pure-JAX mirror of the PyTorch SoftDiceLoss.forward."""
    in_range = jnp.all((inp >= 0) & (inp <= 1))
    inp = jnp.where(in_range, inp, jax.nn.sigmoid(inp))
    N = inp.shape[0]
    x = inp.reshape(N, -1)
    t = target.reshape(N, -1)
    if loss_mask is not None:
        m = loss_mask.reshape(N, -1)
        x = x * m
        t = t * m
    inter = jnp.sum(x * t, axis=1)
    xs = jnp.sum(x, axis=1)
    ts = jnp.sum(t, axis=1)
    dice = (2.0 * inter + smooth) / (xs + ts + smooth)
    return 1.0 - jnp.mean(dice)


if __name__ == "__main__":
    key = jax.random.PRNGKey(0)
    k1, k2, k3, k4, k5, k6, k7 = jax.random.split(key, 7)

    # Case 1: logits (outside [0,1] -> sigmoid branch), with loss mask.
    N, C, H, W = 2, 1, 16, 16
    x = 2.0 * jax.random.normal(k1, (N, C, H, W), dtype=jnp.float32)
    t = (jax.random.uniform(k2, (N, C, H, W)) > 0.5).astype(jnp.float32)
    m = (jax.random.uniform(k3, (N, C, H, W)) > 0.3).astype(jnp.float32)
    out1 = jax.block_until_ready(soft_dice_loss(x, t, m))
    ref1 = _soft_dice_ref(x, t, m)
    assert jnp.allclose(out1, ref1, rtol=1e-5, atol=1e-5), (out1, ref1)

    # Case 2: inputs already in [0,1] (no sigmoid applied), no mask.
    xp = jax.random.uniform(k4, (N, C, H, W), dtype=jnp.float32)
    out2 = jax.block_until_ready(soft_dice_loss(xp, t, None))
    ref2 = _soft_dice_ref(xp, t, None)
    assert jnp.allclose(out2, ref2, rtol=1e-5, atol=1e-5), (out2, ref2)

    # Case 3: multi-block grid (2 row-blocks x 8 col-blocks) to exercise the
    # scratch-accumulate / last-step-epilogue path with a parallel batch axis.
    N2, H2, W2 = 16, 32, 32
    xb = 1.5 * jax.random.normal(k5, (N2, 1, H2, W2), dtype=jnp.float32)
    tb = (jax.random.uniform(k6, (N2, 1, H2, W2)) > 0.5).astype(jnp.float32)
    mb = (jax.random.uniform(k7, (N2, 1, H2, W2)) > 0.4).astype(jnp.float32)
    out3 = jax.block_until_ready(
        soft_dice_loss(xb, tb, mb, max_block_rows=8, max_block_cols=128))
    ref3 = _soft_dice_ref(xb, tb, mb)
    assert jnp.allclose(out3, ref3, rtol=1e-5, atol=1e-5), (out3, ref3)

    print("KERNEL_OK")
</pallas_src>

<mosaic_0001>
module attributes {stable_mosaic.version = 11 : i64} {
  func.func @_soft_dice_kernel(%arg0: i32, %arg1: i32, %arg2: memref<2x256xf32, #tpu.memory_space<vmem>>, %arg3: memref<2x256xf32, #tpu.memory_space<vmem>>, %arg4: memref<2x256xf32, #tpu.memory_space<vmem>>, %arg5: memref<2x1xf32, #tpu.memory_space<vmem>>, %arg6: memref<2x1xf32, #tpu.memory_space<vmem>>, %arg7: memref<2x1xf32, #tpu.memory_space<vmem>>, %arg8: memref<2x1xf32, #tpu.memory_space<vmem>>, %arg9: memref<2x1xf32, #tpu.memory_space<vmem>>, %arg10: memref<2x1xf32, #tpu.memory_space<vmem>>, %arg11: memref<2x1xf32, #tpu.memory_space<vmem>>, %arg12: memref<2x1xf32, #tpu.memory_space<vmem>>, %arg13: memref<2x1xf32, #tpu.memory_space<vmem>>, %arg14: memref<2x1xf32, #tpu.memory_space<vmem>>, %arg15: memref<2x1xf32, #tpu.memory_space<vmem>>, %arg16: memref<2x1xf32, #tpu.memory_space<vmem>>) attributes {dimension_semantics = [#tpu.dimension_semantics<parallel>, #tpu.dimension_semantics<arbitrary>], iteration_bounds = array<i64: 1, 1>, scalar_prefetch = 0 : i64, scratch_operands = 6 : i64, tpu.core_type = #tpu.core_type<tc>, window_params = [{transform_indices = @transform_0, window_bounds = array<i64: 2, 256>}, {transform_indices = @transform_1, window_bounds = array<i64: 2, 256>}, {transform_indices = @transform_2, window_bounds = array<i64: 2, 256>}, {transform_indices = @transform_3, window_bounds = array<i64: 2, 1>}, {transform_indices = @transform_4, window_bounds = array<i64: 2, 1>}, {transform_indices = @transform_5, window_bounds = array<i64: 2, 1>}, {transform_indices = @transform_6, window_bounds = array<i64: 2, 1>}, {transform_indices = @transform_7, window_bounds = array<i64: 2, 1>}, {transform_indices = @transform_8, window_bounds = array<i64: 2, 1>}]} {
    %c0_i32 = arith.constant 0 : i32
    %0 = arith.cmpi eq, %arg1, %c0_i32 : i32
    %1 = arith.extui %0 : i1 to i32
    %c0_i32_0 = arith.constant 0 : i32
    %2 = arith.cmpi ne, %1, %c0_i32_0 : i32
    scf.if %2 {
      %cst_44 = arith.constant 0.000000e+00 : f32
      %59 = vector.broadcast %cst_44 : f32 to vector<2x1xf32>
      %c0_45 = arith.constant 0 : index
      %c0_46 = arith.constant 0 : index
      %60 = vector.load %arg11[%c0_45, %c0_46] : memref<2x1xf32, #tpu.memory_space<vmem>>, vector<2x1xf32>
      tpu.vector_store %arg11[%c0_45, %c0_46], %59 {strides = array<i32>} : memref<2x1xf32, #tpu.memory_space<vmem>>, vector<2x1xf32>,
      %cst_47 = arith.constant 0.000000e+00 : f32
      %61 = vector.broadcast %cst_47 : f32 to vector<2x1xf32>
      %c0_48 = arith.constant 0 : index
      %c0_49 = arith.constant 0 : index
      %62 = vector.load %arg12[%c0_48, %c0_49] : memref<2x1xf32, #tpu.memory_space<vmem>>, vector<2x1xf32>
      tpu.vector_store %arg12[%c0_48, %c0_49], %61 {strides = array<i32>} : memref<2x1xf32, #tpu.memory_space<vmem>>, vector<2x1xf32>,
      %cst_50 = arith.constant 0.000000e+00 : f32
      %63 = vector.broadcast %cst_50 : f32 to vector<2x1xf32>
      %c0_51 = arith.constant 0 : index
      %c0_52 = arith.constant 0 : index
      %64 = vector.load %arg13[%c0_51, %c0_52] : memref<2x1xf32, #tpu.memory_space<vmem>>, vector<2x1xf32>
      tpu.vector_store %arg13[%c0_51, %c0_52], %63 {strides = array<i32>} : memref<2x1xf32, #tpu.memory_space<vmem>>, vector<2x1xf32>,
      %cst_53 = arith.constant 0.000000e+00 : f32
      %65 = vector.broadcast %cst_53 : f32 to vector<2x1xf32>
      %c0_54 = arith.constant 0 : index
      %c0_55 = arith.constant 0 : index
      %66 = vector.load %arg14[%c0_54, %c0_55] : memref<2x1xf32, #tpu.memory_space<vmem>>, vector<2x1xf32>
      tpu.vector_store %arg14[%c0_54, %c0_55], %65 {strides = array<i32>} : memref<2x1xf32, #tpu.memory_space<vmem>>, vector<2x1xf32>,
      %cst_56 = arith.constant 0.000000e+00 : f32
      %67 = vector.broadcast %cst_56 : f32 to vector<2x1xf32>
      %c0_57 = arith.constant 0 : index
      %c0_58 = arith.constant 0 : index
      %68 = vector.load %arg15[%c0_57, %c0_58] : memref<2x1xf32, #tpu.memory_space<vmem>>, vector<2x1xf32>
      tpu.vector_store %arg15[%c0_57, %c0_58], %67 {strides = array<i32>} : memref<2x1xf32, #tpu.memory_space<vmem>>, vector<2x1xf32>,
      %cst_59 = arith.constant 0.000000e+00 : f32
      %69 = vector.broadcast %cst_59 : f32 to vector<2x1xf32>
      %c0_60 = arith.constant 0 : index
      %c0_61 = arith.constant 0 : index
      %70 = vector.load %arg16[%c0_60, %c0_61] : memref<2x1xf32, #tpu.memory_space<vmem>>, vector<2x1xf32>
      tpu.vector_store %arg16[%c0_60, %c0_61], %69 {strides = array<i32>} : memref<2x1xf32, #tpu.memory_space<vmem>>, vector<2x1xf32>,
    } else {
    }
    %c0 = arith.constant 0 : index
    %c0_1 = arith.constant 0 : index
    %3 = vector.load %arg2[%c0, %c0_1] : memref<2x256xf32, #tpu.memory_space<vmem>>, vector<2x256xf32>
    %c0_2 = arith.constant 0 : index
    %c0_3 = arith.constant 0 : index
    %4 = vector.load %arg3[%c0_2, %c0_3] : memref<2x256xf32, #tpu.memory_space<vmem>>, vector<2x256xf32>
    %c0_4 = arith.constant 0 : index
    %c0_5 = arith.constant 0 : index
    %5 = vector.load %arg4[%c0_4, %c0_5] : memref<2x256xf32, #tpu.memory_space<vmem>>, vector<2x256xf32>
    %cst = arith.constant 0.000000e+00 : f32
    %6 = vector.broadcast %cst : f32 to vector<2x256xf32>
    %7 = arith.subf %6, %3 : vector<2x256xf32>
    %8 = math.exp %7 : vector<2x256xf32>
    %cst_6 = arith.constant 1.000000e+00 : f32
    %9 = vector.broadcast %cst_6 : f32 to vector<2x256xf32>
    %10 = arith.addf %9, %8 : vector<2x256xf32>
    %cst_7 = arith.constant 1.000000e+00 : f32
    %11 = vector.broadcast %cst_7 : f32 to vector<2x256xf32>
    %12 = arith.divf %11, %10 : vector<2x256xf32>
    %13 = arith.mulf %3, %5 : vector<2x256xf32>
    %14 = arith.mulf %12, %5 : vector<2x256xf32>
    %15 = arith.mulf %4, %5 : vector<2x256xf32>
    %c0_8 = arith.constant 0 : index
    %c0_9 = arith.constant 0 : index
    %16 = vector.load %arg11[%c0_8, %c0_9] : memref<2x1xf32, #tpu.memory_space<vmem>>, vector<2x1xf32>
    %cst_10 = arith.constant dense<0.000000e+00> : vector<2xf32>
    %17 = vector.multi_reduction <add>, %15, %cst_10 [1] : vector<2x256xf32> to vector<2xf32>
    %18 = vector.shape_cast %17 : vector<2xf32> to vector<2x1xf32>
    %19 = arith.addf %16, %18 : vector<2x1xf32>
    %c0_11 = arith.constant 0 : index
    %c0_12 = arith.constant 0 : index
    %20 = vector.load %arg11[%c0_11, %c0_12] : memref<2x1xf32, #tpu.memory_space<vmem>>, vector<2x1xf32>
    tpu.vector_store %arg11[%c0_11, %c0_12], %19 {strides = array<i32>} : memref<2x1xf32, #tpu.memory_space<vmem>>, vector<2x1xf32>,
    %c0_13 = arith.constant 0 : index
    %c0_14 = arith.constant 0 : index
    %21 = vector.load %arg12[%c0_13, %c0_14] : memref<2x1xf32, #tpu.memory_space<vmem>>, vector<2x1xf32>
    %22 = arith.mulf %13, %15 : vector<2x256xf32>
    %cst_15 = arith.constant dense<0.000000e+00> : vector<2xf32>
    %23 = vector.multi_reduction <add>, %22, %cst_15 [1] : vector<2x256xf32> to vector<2xf32>
    %24 = vector.shape_cast %23 : vector<2xf32> to vector<2x1xf32>
    %25 = arith.addf %21, %24 : vector<2x1xf32>
    %c0_16 = arith.constant 0 : index
    %c0_17 = arith.constant 0 : index
    %26 = vector.load %arg12[%c0_16, %c0_17] : memref<2x1xf32, #tpu.memory_space<vmem>>, vector<2x1xf32>
    tpu.vector_store %arg12[%c0_16, %c0_17], %25 {strides = array<i32>} : memref<2x1xf32, #tpu.memory_space<vmem>>, vector<2x1xf32>,
    %c0_18 = arith.constant 0 : index
    %c0_19 = arith.constant 0 : index
    %27 = vector.load %arg13[%c0_18, %c0_19] : memref<2x1xf32, #tpu.memory_space<vmem>>, vector<2x1xf32>
    %cst_20 = arith.constant dense<0.000000e+00> : vector<2xf32>
    %28 = vector.multi_reduction <add>, %13, %cst_20 [1] : vector<2x256xf32> to vector<2xf32>
    %29 = vector.shape_cast %28 : vector<2xf32> to vector<2x1xf32>
    %30 = arith.addf %27, %29 : vector<2x1xf32>
    %c0_21 = arith.constant 0 : index
    %c0_22 = arith.constant 0 : index
    %31 = vector.load %arg13[%c0_21, %c0_22] : memref<2x1xf32, #tpu.memory_space<vmem>>, vector<2x1xf32>
    tpu.vector_store %arg13[%c0_21, %c0_22], %30 {strides = array<i32>} : memref<2x1xf32, #tpu.memory_space<vmem>>, vector<2x1xf32>,
    %c0_23 = arith.constant 0 : index
    %c0_24 = arith.constant 0 : index
    %32 = vector.load %arg14[%c0_23, %c0_24] : memref<2x1xf32, #tpu.memory_space<vmem>>, vector<2x1xf32>
    %33 = arith.mulf %14, %15 : vector<2x256xf32>
    %cst_25 = arith.constant dense<0.000000e+00> : vector<2xf32>
    %34 = vector.multi_reduction <add>, %33, %cst_25 [1] : vector<2x256xf32> to vector<2xf32>
    %35 = vector.shape_cast %34 : vector<2xf32> to vector<2x1xf32>
    %36 = arith.addf %32, %35 : vector<2x1xf32>
    %c0_26 = arith.constant 0 : index
    %c0_27 = arith.constant 0 : index
    %37 = vector.load %arg14[%c0_26, %c0_27] : memref<2x1xf32, #tpu.memory_space<vmem>>, vector<2x1xf32>
    tpu.vector_store %arg14[%c0_26, %c0_27], %36 {strides = array<i32>} : memref<2x1xf32, #tpu.memory_space<vmem>>, vector<2x1xf32>,
    %c0_28 = arith.constant 0 : index
    %c0_29 = arith.constant 0 : index
    %38 = vector.load %arg15[%c0_28, %c0_29] : memref<2x1xf32, #tpu.memory_space<vmem>>, vector<2x1xf32>
    %cst_30 = arith.constant dense<0.000000e+00> : vector<2xf32>
    %39 = vector.multi_reduction <add>, %14, %cst_30 [1] : vector<2x256xf32> to vector<2xf32>
    %40 = vector.shape_cast %39 : vector<2xf32> to vector<2x1xf32>
    %41 = arith.addf %38, %40 : vector<2x1xf32>
    %c0_31 = arith.constant 0 : index
    %c0_32 = arith.constant 0 : index
    %42 = vector.load %arg15[%c0_31, %c0_32] : memref<2x1xf32, #tpu.memory_space<vmem>>, vector<2x1xf32>
    tpu.vector_store %arg15[%c0_31, %c0_32], %41 {strides = array<i32>} : memref<2x1xf32, #tpu.memory_space<vmem>>, vector<2x1xf32>,
    %c0_33 = arith.constant 0 : index
    %c0_34 = arith.constant 0 : index
    %43 = vector.load %arg16[%c0_33, %c0_34] : memref<2x1xf32, #tpu.memory_space<vmem>>, vector<2x1xf32>
    %cst_35 = arith.constant 0.000000e+00 : f32
    %44 = vector.broadcast %cst_35 : f32 to vector<2x256xf32>
    %45 = arith.cmpf olt, %3, %44 : vector<2x256xf32>
    %cst_36 = arith.constant 1.000000e+00 : f32
    %46 = vector.broadcast %cst_36 : f32 to vector<2x256xf32>
    %47 = arith.cmpf ogt, %3, %46 : vector<2x256xf32>
    %48 = arith.ori %45, %47 : vector<2x256xi1>
    %cst_37 = arith.constant 1.000000e+00 : f32
    %cst_38 = arith.constant 0.000000e+00 : f32
    %49 = vector.broadcast %cst_37 : f32 to vector<2x256xf32>
    %50 = vector.broadcast %cst_38 : f32 to vector<2x256xf32>
    %51 = arith.select %48, %49, %50 : vector<2x256xi1>, vector<2x256xf32>
    %cst_39 = arith.constant dense<0.000000e+00> : vector<2xf32>
    %52 = vector.multi_reduction <add>, %51, %cst_39 [1] : vector<2x256xf32> to vector<2xf32>
    %53 = vector.shape_cast %52 : vector<2xf32> to vector<2x1xf32>
    %54 = arith.addf %43, %53 : vector<2x1xf32>
    %c0_40 = arith.constant 0 : index
    %c0_41 = arith.constant 0 : index
    %55 = vector.load %arg16[%c0_40, %c0_41] : memref<2x1xf32, #tpu.memory_space<vmem>>, vector<2x1xf32>
    tpu.vector_store %arg16[%c0_40, %c0_41], %54 {strides = array<i32>} : memref<2x1xf32, #tpu.memory_space<vmem>>, vector<2x1xf32>,
    %c0_i32_42 = arith.constant 0 : i32
    %56 = arith.cmpi eq, %arg1, %c0_i32_42 : i32
    %57 = arith.extui %56 : i1 to i32
    %c0_i32_43 = arith.constant 0 : i32
    %58 = arith.cmpi ne, %57, %c0_i32_43 : i32
    scf.if %58 {
      %c0_44 = arith.constant 0 : index
      %c0_45 = arith.constant 0 : index
      %59 = vector.load %arg11[%c0_44, %c0_45] : memref<2x1xf32, #tpu.memory_space<vmem>>, vector<2x1xf32>
      %c0_46 = arith.constant 0 : index
      %c0_47 = arith.constant 0 : index
      %60 = vector.load %arg5[%c0_46, %c0_47] : memref<2x1xf32, #tpu.memory_space<vmem>>, vector<2x1xf32>
      tpu.vector_store %arg5[%c0_46, %c0_47], %59 {strides = array<i32>} : memref<2x1xf32, #tpu.memory_space<vmem>>, vector<2x1xf32>,
      %c0_48 = arith.constant 0 : index
      %c0_49 = arith.constant 0 : index
      %61 = vector.load %arg12[%c0_48, %c0_49] : memref<2x1xf32, #tpu.memory_space<vmem>>, vector<2x1xf32>
      %c0_50 = arith.constant 0 : index
      %c0_51 = arith.constant 0 : index
      %62 = vector.load %arg6[%c0_50, %c0_51] : memref<2x1xf32, #tpu.memory_space<vmem>>, vector<2x1xf32>
      tpu.vector_store %arg6[%c0_50, %c0_51], %61 {strides = array<i32>} : memref<2x1xf32, #tpu.memory_space<vmem>>, vector<2x1xf32>,
      %c0_52 = arith.constant 0 : index
      %c0_53 = arith.constant 0 : index
      %63 = vector.load %arg13[%c0_52, %c0_53] : memref<2x1xf32, #tpu.memory_space<vmem>>, vector<2x1xf32>
      %c0_54 = arith.constant 0 : index
      %c0_55 = arith.constant 0 : index
      %64 = vector.load %arg7[%c0_54, %c0_55] : memref<2x1xf32, #tpu.memory_space<vmem>>, vector<2x1xf32>
      tpu.vector_store %arg7[%c0_54, %c0_55], %63 {strides = array<i32>} : memref<2x1xf32, #tpu.memory_space<vmem>>, vector<2x1xf32>,
      %c0_56 = arith.constant 0 : index
      %c0_57 = arith.constant 0 : index
      %65 = vector.load %arg14[%c0_56, %c0_57] : memref<2x1xf32, #tpu.memory_space<vmem>>, vector<2x1xf32>
      %c0_58 = arith.constant 0 : index
      %c0_59 = arith.constant 0 : index
      %66 = vector.load %arg8[%c0_58, %c0_59] : memref<2x1xf32, #tpu.memory_space<vmem>>, vector<2x1xf32>
      tpu.vector_store %arg8[%c0_58, %c0_59], %65 {strides = array<i32>} : memref<2x1xf32, #tpu.memory_space<vmem>>, vector<2x1xf32>,
      %c0_60 = arith.constant 0 : index
      %c0_61 = arith.constant 0 : index
      %67 = vector.load %arg15[%c0_60, %c0_61] : memref<2x1xf32, #tpu.memory_space<vmem>>, vector<2x1xf32>
      %c0_62 = arith.constant 0 : index
      %c0_63 = arith.constant 0 : index
      %68 = vector.load %arg9[%c0_62, %c0_63] : memref<2x1xf32, #tpu.memory_space<vmem>>, vector<2x1xf32>
      tpu.vector_store %arg9[%c0_62, %c0_63], %67 {strides = array<i32>} : memref<2x1xf32, #tpu.memory_space<vmem>>, vector<2x1xf32>,
      %c0_64 = arith.constant 0 : index
      %c0_65 = arith.constant 0 : index
      %69 = vector.load %arg16[%c0_64, %c0_65] : memref<2x1xf32, #tpu.memory_space<vmem>>, vector<2x1xf32>
      %c0_66 = arith.constant 0 : index
      %c0_67 = arith.constant 0 : index
      %70 = vector.load %arg10[%c0_66, %c0_67] : memref<2x1xf32, #tpu.memory_space<vmem>>, vector<2x1xf32>
      tpu.vector_store %arg10[%c0_66, %c0_67], %69 {strides = array<i32>} : memref<2x1xf32, #tpu.memory_space<vmem>>, vector<2x1xf32>,
    } else {
    }
    return
  }
  func.func @transform_0(%arg0: i32, %arg1: i32) -> (i32, i32) {
    %c0_i32 = arith.constant 0 : i32
    return %arg0, %arg1 : i32, i32
  }
  func.func @transform_1(%arg0: i32, %arg1: i32) -> (i32, i32) {
    %c0_i32 = arith.constant 0 : i32
    return %arg0, %arg1 : i32, i32
  }
  func.func @transform_2(%arg0: i32, %arg1: i32) -> (i32, i32) {
    %c0_i32 = arith.constant 0 : i32
    return %arg0, %arg1 : i32, i32
  }
  func.func @transform_3(%arg0: i32, %arg1: i32) -> (i32, i32) {
    %c0_i32 = arith.constant 0 : i32
    %c0_i32_0 = arith.constant 0 : i32
    return %arg0, %c0_i32 : i32, i32
  }
  func.func @transform_4(%arg0: i32, %arg1: i32) -> (i32, i32) {
    %c0_i32 = arith.constant 0 : i32
    %c0_i32_0 = arith.constant 0 : i32
    return %arg0, %c0_i32 : i32, i32
  }
  func.func @transform_5(%arg0: i32, %arg1: i32) -> (i32, i32) {
    %c0_i32 = arith.constant 0 : i32
    %c0_i32_0 = arith.constant 0 : i32
    return %arg0, %c0_i32 : i32, i32
  }
  func.func @transform_6(%arg0: i32, %arg1: i32) -> (i32, i32) {
    %c0_i32 = arith.constant 0 : i32
    %c0_i32_0 = arith.constant 0 : i32
    return %arg0, %c0_i32 : i32, i32
  }
  func.func @transform_7(%arg0: i32, %arg1: i32) -> (i32, i32) {
    %c0_i32 = arith.constant 0 : i32
    %c0_i32_0 = arith.constant 0 : i32
    return %arg0, %c0_i32 : i32, i32
  }
  func.func @transform_8(%arg0: i32, %arg1: i32) -> (i32, i32) {
    %c0_i32 = arith.constant 0 : i32
    %c0_i32_0 = arith.constant 0 : i32
    return %arg0, %c0_i32 : i32, i32
  }
}

</mosaic_0001>

<bundles_post_ra>
// kernel: tpu_custom_call.1
= control target key start
LH: loop header
LB: loop body
LE: loop exit
PB: predicated region body
PF: predicated region fallthrough
CT: control target
= control target key end

     0   :  { %14 = vsyncpa [#allocation9], 0  ;;  %s426_s0 = inlined_call_operand.hbm [shape: f32[2,256], index: 0, kind: input, shape index: {}]   ;;  %s427_s1 = inlined_call_operand.hbm [shape: f32[2,256], index: 1, kind: input, shape index: {}]   ;;  %s428_s2 = inlined_call_operand.hbm [shape: f32[2,256], index: 2, kind: input, shape index: {}]   ;;  %s429_s3 = inlined_call_operand.vmem [shape: f32[2,1], index: 3, kind: output, shape index: {0}]   ;;  %s430_s4 = inlined_call_operand.vmem [shape: f32[2,1], index: 4, kind: output, shape index: {1}]   ;;  %s431_s5 = inlined_call_operand.vmem [shape: f32[2,1], index: 5, kind: output, shape index: {2}]   ;;  %s432_s6 = inlined_call_operand.vmem [shape: f32[2,1], index: 6, kind: output, shape index: {3}]   ;;  %s433_s7 = inlined_call_operand.vmem [shape: f32[2,1], index: 7, kind: output, shape index: {4}]   ;;  %s434_s8 = inlined_call_operand.vmem [shape: f32[2,1], index: 8, kind: output, shape index: {5}]  }
   0x1   :  { %15 = vsyncpa [#allocation11], 0  ;;  %s32_s29 = sshll.u32 %s427_s1, 4  ;;  %s314_s30 = smov [#allocation10]   ;;  %s33_s29 = int_to_ptr.hbm [resolvable:$true] %s32_s29 }
   0x2   :  { %s34_s9 = sshll.u32 %s314_s30, 4  ;;  %s21_s12 = sshll.u32 %s426_s0, 4  ;;  %s35_s9 = int_to_ptr.vmem [resolvable:$true] %s34_s9  ;;  %s22_s12 = int_to_ptr.hbm [resolvable:$true] %s21_s12 }
   0x3   :  { %37 = dma.hbm_to_vmem [thread:$0]  %s33_s29, 64, %s35_s9, [#allocation11]  }
   0x4   :  { %s315_s13 = smov [#allocation8]   ;;  %s43_s17 = sshll.u32 %s428_s2, 4  ;;  %s44_s17 = int_to_ptr.hbm [resolvable:$true] %s43_s17 }
   0x5   :  { %s23_s14 = sshll.u32 %s315_s13, 4  ;;  %s316_s1 = smov [#allocation12]   ;;  %s24_s14 = int_to_ptr.vmem [resolvable:$true] %s23_s14 }
   0x6   :  { %26 = dma.hbm_to_vmem [thread:$0]  %s22_s12, 64, %s24_s14, [#allocation9]  }
   0x7   :  { %s45_s18 = sshll.u32 %s316_s1, 4  ;;  %s46_s18 = int_to_ptr.vmem [resolvable:$true] %s45_s18 }
   0x8   :  { %48 = dma.hbm_to_vmem [thread:$0]  %s44_s17, 64, %s46_s18, [#allocation11]  }
   0x9   :  { %310 = dma.done.wait [#allocation9], 64  }
   0xa   :  { %311 = vsyncadd [#allocation9], 4294967232 }
   0xb   :  { %312 = dma.done.wait [#allocation11], 128  }
   0xc   :  { %313 = vsyncadd [#allocation11], 4294967168  ;;  %v73_v0 = vld [vmem:[#allocation10] sm:$0xf]  ;;  %v74_v1 = vld [vmem:[#allocation12] sm:$0xf] }
   0xd   :  { %v372_v2 = vld [vmem:[#allocation8] sm:$0xf]  ;;  %v96_v3 = vmul.f32 %v74_v1, %v73_v0  ;;  %vm104_vm0 = vcmask 1041408   ;;  %vm65_vm5 = vcmask 1024   ;;  %v317_v36 = vmov 0.0  }
   0xe   :  { %v75_v4 = vsub.f32 0.0, %v372_v2  ;;  %v94_v6 = vmul.f32 %v74_v1, %v372_v2  ;;  %66 = vst.msk [vmem:[#allocation2] sm:$0x3] %vm65_vm5, %v317_v36  ;;  %vm172_vm6 = vcmp.lt.f32.partialorder %v372_v2, 0.0  ;;  %vm173_vm7 = vcmp.gt.f32.partialorder %v372_v2, 1.0 }
   0xf   :  { %99 = vst [vmem:[#allocation1] ss:$4 sm:$0xff] %v96_v3  ;;  %vm174_vm8 = vmor %vm172_vm6, %vm173_vm7 }
  0x10   :  { %v76_v5 = vmul.f32 1.442695, %v75_v4  ;;  %v114_v7 = vmul.f32 %v96_v3, %v94_v6  ;;  %67 = vst.msk [vmem:[#allocation3] sm:$0x3] %vm65_vm5, %v317_v36  ;;  %v175_v43 = vsel %vm174_vm8, 1.0, %v317_v36 }
  0x11   :  { %68 = vst.msk [vmem:[#allocation4] sm:$0x3] %vm65_vm5, %v317_v36 }
  0x12   :  { %234 = vpow2.f32 %v76_v5  ;;  %69 = vst.msk [vmem:[#allocation5] sm:$0x3] %vm65_vm5, %v317_v36 }
  0x13   :  { %70 = vst.msk [vmem:[#allocation6] sm:$0x3] %vm65_vm5, %v317_v36 }
  0x14   :  { %71 = vst.msk [vmem:[#allocation7] sm:$0x3] %vm65_vm5, %v317_v36 }
  0x15   :  { %v97_v54 = vld [vmem:[#allocation2] sm:$0x3] }
  0x16   :  { %v100_v8 = vld.sshfl [vmem:[#allocation1] sm:$0xff pattern:$0x73625140]  ;;  %v101_v9 = vld.sshfl [vmem:[#allocation1 + $0x8] sm:$0xff pattern:$0x73625140] }
  0x17   :  { %v105_v11 = vsel %vm104_vm0, %v100_v8, 0.0  ;;  %v106_v12 = vsel %vm104_vm0, %v101_v9, 0.0  ;;  %116 = vst [vmem:[#allocation1] ss:$4 sm:$0xff] %v114_v7  ;;  %v113_v61 = vld [vmem:[#allocation3] sm:$0x3] }
  0x18   :  { %v235_v10 = vpop.eup %234  ;;  %v107_v13 = vadd.f32 %v106_v12, %v105_v11  ;;  %v128_v58 = vld [vmem:[#allocation4] sm:$0x3] }
  0x19   :  { %v78_v14 = vadd.f32 1.0, %v235_v10  ;;  %v142_v2 = vld [vmem:[#allocation5] sm:$0x3] }
  0x1a   :  { %108 = vadd.xlane.f32.xlu0 %v107_v13  ;;  %v157_v5 = vld [vmem:[#allocation6] sm:$0x3] }
  0x1b   :  { %236 = vrcp.f32 %v78_v14  ;;  %v90_v19 = vand.u32 2147483648, %v78_v14  ;;  %vm84_vm1 = vweird.f32 %v78_v14  ;;  %v88_v23 = vand.u32 2147483647, %v78_v14  ;;  %v171_v9 = vld [vmem:[#allocation7] sm:$0x3] }
  0x1d   :  { %v91_v26 = vor.u32 1.1754944e-38, %v90_v19  ;;  %vm89_vm4 = vcmp.eq.f32.partialorder %v88_v23, 8.507059e+37 }
  0x1e   :  { %v117_v15 = vld.sshfl [vmem:[#allocation1] sm:$0xff pattern:$0x73625140]  ;;  %v118_v16 = vld.sshfl [vmem:[#allocation1 + $0x8] sm:$0xff pattern:$0x73625140] }
  0x1f   :  { %130 = vst [vmem:[#allocation1] ss:$4 sm:$0xff] %v94_v6  ;;  %v121_v20 = vsel %vm104_vm0, %v117_v15, 0.0  ;;  %v122_v21 = vsel %vm104_vm0, %v118_v16, 0.0 }
  0x20   :  { %v123_v24 = vadd.f32 %v122_v21, %v121_v20 }
  0x21   :  { %v237_v17 = vpop.eup %236 }
  0x22   :  { %v80_v18 = vmul.f32 %v237_v17, %v78_v14  ;;  %vm85_vm2 = vweird.f32 %v237_v17  ;;  %124 = vadd.xlane.f32.xlu0 %v123_v24 }
  0x23   :  { %vm86_vm3 = vmor %vm84_vm1, %vm85_vm2 }
  0x24   :  { %v81_v22 = vsub.f32 1.0, %v80_v18 }
  0x26   :  { %v82_v25 = vmul.f32 %v237_v17, %v81_v22  ;;  %v131_v27 = vld.sshfl [vmem:[#allocation1] sm:$0xff pattern:$0x73625140]  ;;  %v132_v28 = vld.sshfl [vmem:[#allocation1 + $0x8] sm:$0xff pattern:$0x73625140] }
  0x27   :  { %v135_v30 = vsel %vm104_vm0, %v131_v27, 0.0  ;;  %v136_v31 = vsel %vm104_vm0, %v132_v28, 0.0 }
  0x28   :  { %v83_v29 = vadd.f32 %v237_v17, %v82_v25  ;;  %v137_v32 = vadd.f32 %v136_v31, %v135_v30 }
  0x2a   :  { %v87_v33 = vsel %vm86_vm3, %v237_v17, %v83_v29  ;;  %138 = vadd.xlane.f32.xlu1 %v137_v32 }
  0x2b   :  { %v92_v34 = vsel %vm89_vm4, %v91_v26, %v87_v33 }
  0x2c   :  { %v95_v35 = vmul.f32 %v92_v34, %v74_v1 }
  0x2e   :  { %v143_v37 = vmul.f32 %v96_v3, %v95_v35 }
  0x30   :  { %145 = vst [vmem:[#allocation1] ss:$4 sm:$0xff] %v143_v37 }
  0x37   :  { %v146_v38 = vld.sshfl [vmem:[#allocation1] sm:$0xff pattern:$0x73625140]  ;;  %v147_v39 = vld.sshfl [vmem:[#allocation1 + $0x8] sm:$0xff pattern:$0x73625140] }
  0x38   :  { %159 = vst [vmem:[#allocation1] ss:$4 sm:$0xff] %v95_v35  ;;  %v150_v40 = vsel %vm104_vm0, %v146_v38, 0.0  ;;  %v151_v41 = vsel %vm104_vm0, %v147_v39, 0.0 }
  0x39   :  { %v152_v42 = vadd.f32 %v151_v41, %v150_v40 }
  0x3b   :  { %153 = vadd.xlane.f32.xlu1 %v152_v42 }
  0x3f   :  { %v160_v44 = vld.sshfl [vmem:[#allocation1] sm:$0xff pattern:$0x73625140]  ;;  %v161_v45 = vld.sshfl [vmem:[#allocation1 + $0x8] sm:$0xff pattern:$0x73625140] }
  0x40   :  { %v164_v46 = vsel %vm104_vm0, %v160_v44, 0.0  ;;  %v165_v47 = vsel %vm104_vm0, %v161_v45, 0.0  ;;  %177 = vst [vmem:[#allocation1] ss:$4 sm:$0xff] %v175_v43 }
  0x41   :  { %v166_v48 = vadd.f32 %v165_v47, %v164_v46 }
  0x43   :  { %167 = vadd.xlane.f32.xlu2 %v166_v48 }
  0x47   :  { %v178_v49 = vld.sshfl [vmem:[#allocation1] sm:$0xff pattern:$0x73625140]  ;;  %v179_v50 = vld.sshfl [vmem:[#allocation1 + $0x8] sm:$0xff pattern:$0x73625140] }
  0x48   :  { %v182_v51 = vsel %vm104_vm0, %v178_v49, 0.0  ;;  %v183_v52 = vsel %vm104_vm0, %v179_v50, 0.0 }
  0x49   :  { %v184_v53 = vadd.f32 %v183_v52, %v182_v51 }
  0x4b   :  { %185 = vadd.xlane.f32.xlu2 %v184_v53 }
  0x8d   :  { %v109_v55 = vpop.xlane.xlu0 %108 }
  0x8e   :  { %v110_v56 = vadd.f32 %v109_v55, %v97_v54 }
  0x90   :  { %112 = vst.msk [vmem:[#allocation2] sm:$0x3] %vm65_vm5, %v110_v56 }
  0x95   :  { %v125_v60 = vpop.xlane.xlu0 %124 }
  0x96   :  { %v126_v63 = vadd.f32 %v125_v60, %v113_v61 }
  0x97   :  { %v192_v57 = vld [vmem:[#allocation2] sm:$0x3] }
  0x98   :  { %193 = vst.msk [vmem:[%s429_s3] sm:$0x3] %vm65_vm5, %v192_v57 }
  0x99   :  { %127 = vst.msk [vmem:[#allocation3] sm:$0x3] %vm65_vm5, %v126_v63 }
  0x9d   :  { %v139_v59 = vpop.xlane.xlu1 %138 }
  0x9e   :  { %v140_v62 = vadd.f32 %v139_v59, %v128_v58 }
  0xa0   :  { %141 = vst.msk [vmem:[#allocation4] sm:$0x3] %vm65_vm5, %v140_v62  ;;  %v194_v1 = vld [vmem:[#allocation3] sm:$0x3] }
  0xa1   :  { %195 = vst.msk [vmem:[%s430_s4] sm:$0x3] %vm65_vm5, %v194_v1 }
  0xa7   :  { %v196_v0 = vld [vmem:[#allocation4] sm:$0x3] }
  0xa8   :  { %197 = vst.msk [vmem:[%s431_s5] sm:$0x3] %vm65_vm5, %v196_v0 }
  0xae   :  { %v154_v3 = vpop.xlane.xlu1 %153 }
  0xaf   :  { %v155_v4 = vadd.f32 %v154_v3, %v142_v2 }
  0xb1   :  { %156 = vst.msk [vmem:[#allocation5] sm:$0x3] %vm65_vm5, %v155_v4 }
  0xb6   :  { %v168_v6 = vpop.xlane.xlu2 %167 }
  0xb7   :  { %v169_v7 = vadd.f32 %v168_v6, %v157_v5 }
  0xb8   :  { %v198_v8 = vld [vmem:[#allocation5] sm:$0x3] }
  0xb9   :  { %170 = vst.msk [vmem:[#allocation6] sm:$0x3] %vm65_vm5, %v169_v7 }
  0xba   :  { %199 = vst.msk [vmem:[%s432_s6] sm:$0x3] %vm65_vm5, %v198_v8 }
  0xbe   :  { %v186_v10 = vpop.xlane.xlu2 %185 }
  0xbf   :  { %v187_v11 = vadd.f32 %v186_v10, %v171_v9 }
  0xc0   :  { %v200_v12 = vld [vmem:[#allocation6] sm:$0x3] }
  0xc1   :  { %201 = vst.msk [vmem:[%s433_s7] sm:$0x3] %vm65_vm5, %v200_v12 }
  0xc2   :  { %188 = vst.msk [vmem:[#allocation7] sm:$0x3] %vm65_vm5, %v187_v11 }
  0xc9   :  { %v202_v13 = vld [vmem:[#allocation7] sm:$0x3] }
  0xca   :  { %203 = vst.msk [vmem:[%s434_s8] sm:$0x3] %vm65_vm5, %v202_v13 }
  0xcb   :  { %228 = vsyncpa [#allocation9], 1 }
  0xcc   :  { %229 = vsyncpa [#allocation11], 1 }

</bundles_post_ra>
